<compile_context>
chip_gen: v6e
topology: v6e:2x2x1
jax: 0.10.0
libtpu: 0.0.40
codegen_flags: <defaults>
</compile_context>

<pallas_src>
import functools

import jax
import jax.numpy as jnp
from jax.experimental import pallas as pl
from jax.experimental.pallas import tpu as pltpu


# ----------------------------- Pallas kernels ------------------------------

def _matmul_bn_kernel(x_ref, w_ref, shift_ref, o_ref, *, relu):
    """out = relu?( x @ w_scaled + shift )   (1x1 conv + folded BN)"""
    acc = jnp.dot(x_ref[...], w_ref[...], preferred_element_type=jnp.float32)
    y = acc + shift_ref[...]
    if relu:
        y = jnp.maximum(y, 0.0)
    o_ref[...] = y.astype(o_ref.dtype)


def _matmul_bn_add_relu_kernel(x_ref, w_ref, shift_ref, res_ref, o_ref):
    """out = relu( x @ w_scaled + shift + residual )   (conv3 + bn3 + add + relu)"""
    acc = jnp.dot(x_ref[...], w_ref[...], preferred_element_type=jnp.float32)
    y = acc + shift_ref[...] + res_ref[...].astype(jnp.float32)
    o_ref[...] = jnp.maximum(y, 0.0).astype(o_ref.dtype)


def _dual_matmul_bn_kernel(x_ref, w1_ref, b1_ref, wd_ref, bd_ref, o1_ref, od_ref):
    """Shared x tile: o1 = relu(x@w1+b1), identity = x@wd+bd  (conv1 + downsample)."""
    x = x_ref[...]
    a1 = jnp.dot(x, w1_ref[...], preferred_element_type=jnp.float32)
    o1_ref[...] = jnp.maximum(a1 + b1_ref[...], 0.0).astype(o1_ref.dtype)
    ad = jnp.dot(x, wd_ref[...], preferred_element_type=jnp.float32)
    od_ref[...] = (ad + bd_ref[...]).astype(od_ref.dtype)


def _conv3x3_bn_relu_kernel(x_hbm, w_ref, shift_ref, o_ref, xbuf, acc_ref, sem,
                            *, tr, H, W):
    """3x3 pad-1 stride-1 conv + folded BN + ReLU for `tr` output rows of one image.

    x_hbm: padded o1, shape (N*(H+2), W+2, C), lives in HBM (manual double-buffered DMA).
    Accumulates the 9 tap matmuls [tr*W, C] @ [C, C] into an f32 VMEM scratch.
    """
    g = pl.program_id(0)
    ng = pl.num_programs(0)
    gr = H // tr                                   # row-groups per image (static)

    def src_row(step):
        n = step // gr
        i0 = (step % gr) * tr
        return n * (H + 2) + i0

    def fetch(step, slot):
        pltpu.make_async_copy(x_hbm.at[pl.ds(src_row(step), tr + 2)],
                              xbuf.at[slot], sem.at[slot]).start()

    slot = g & 1

    @pl.when(g == 0)
    def _():
        fetch(g, slot)                             # prime the pipeline

    @pl.when(g + 1 < ng)
    def _():
        fetch(g + 1, 1 - slot)                     # prefetch next row group

    pltpu.make_async_copy(x_hbm.at[pl.ds(src_row(g), tr + 2)],
                          xbuf.at[slot], sem.at[slot]).wait()

    xb = xbuf[slot]                                # (tr+2, W+2, C) bf16
    C = w_ref.shape[1]
    acc_ref[...] = jnp.zeros_like(acc_ref)
    for dy in range(3):
        for dx in range(3):
            xa = xb[dy:dy + tr, dx:dx + W, :].reshape(tr * W, C)
            acc_ref[...] += jnp.dot(xa, w_ref[dy * 3 + dx],
                                    preferred_element_type=jnp.float32)
    y = acc_ref[...] + shift_ref[...]
    o_ref[...] = jnp.maximum(y, 0.0).astype(o_ref.dtype)


# ---------------------------- pallas_call wrappers ---------------------------

def _vmem_limit(nbytes):
    # Keep a generous scoped-VMEM limit that stays under v7x's 64 MiB physical VMEM.
    return int(max(32 << 20, min(2 * nbytes, 56 << 20)))


def _pick_tm(M, K, Cout, extra_cols=0, budget=24 << 20):
    """Largest M-tile whose double-buffered bf16 tiles + resident weights fit a budget."""
    m8 = -(-M // 8) * 8
    for cand in (512, 256, 128, 64, 32, 16, 8):
        need = 2 * cand * (K + Cout + extra_cols) * 2 + K * Cout * 2
        if cand <= m8 and need <= budget:
            return cand
    return 8


def fused_matmul_bn(x2d, w, shift, *, relu, residual=None, out_dtype=jnp.bfloat16):
    """out = [relu](x @ w + shift [+ residual]);  bf16 operands, f32 accumulation."""
    M, K = x2d.shape
    Cout = w.shape[1]
    extra = Cout if residual is not None else 0
    tm = _pick_tm(M, K, Cout, extra)
    Mp = -(-M // tm) * tm
    if Mp != M:                                     # pad tail instead of asserting
        x2d = jnp.pad(x2d, ((0, Mp - M), (0, 0)))
        if residual is not None:
            residual = jnp.pad(residual, ((0, Mp - M), (0, 0)))

    in_specs = [pl.BlockSpec((tm, K), lambda i: (i, 0)),       # activation tile
                pl.BlockSpec((K, Cout), lambda i: (0, 0)),     # scaled weights (resident)
                pl.BlockSpec((1, Cout), lambda i: (0, 0))]     # folded BN shift
    args = [x2d, w, shift]
    if residual is None:
        kernel = functools.partial(_matmul_bn_kernel, relu=relu)
    else:
        kernel = _matmul_bn_add_relu_kernel
        in_specs.append(pl.BlockSpec((tm, Cout), lambda i: (i, 0)))
        args.append(residual)

    est = (2 * tm * K * 2 + K * Cout * 2 + Cout * 4 + 2 * tm * Cout * 4
           + (2 * tm * Cout * 2 if residual is not None else 0))
    out = pl.pallas_call(
        kernel,
        out_shape=jax.ShapeDtypeStruct((Mp, Cout), out_dtype),
        grid=(Mp // tm,),
        in_specs=in_specs,
        out_specs=pl.BlockSpec((tm, Cout), lambda i: (i, 0)),
        compiler_params=pltpu.CompilerParams(
            dimension_semantics=("parallel",),
            vmem_limit_bytes=_vmem_limit(est)),
    )(*args)
    return out[:M] if Mp != M else out


def fused_conv1_downsample(x2d, w1, b1, wd, bd):
    """Stride-1 downsample blocks: conv1(+bn+relu) and downsample 1x1(+bn) share x."""
    M, Cin = x2d.shape
    C1, Cd = w1.shape[1], wd.shape[1]
    tm = _pick_tm(M, Cin, C1 + Cd)
    Mp = -(-M // tm) * tm
    if Mp != M:
        x2d = jnp.pad(x2d, ((0, Mp - M), (0, 0)))
    est = 2 * tm * (Cin + C1 + Cd) * 2 + Cin * (C1 + Cd) * 2 + (C1 + Cd) * 4
    o1, od = pl.pallas_call(
        _dual_matmul_bn_kernel,
        out_shape=(jax.ShapeDtypeStruct((Mp, C1), jnp.bfloat16),
                   jax.ShapeDtypeStruct((Mp, Cd), jnp.bfloat16)),
        grid=(Mp // tm,),
        in_specs=[pl.BlockSpec((tm, Cin), lambda i: (i, 0)),
                  pl.BlockSpec((Cin, C1), lambda i: (0, 0)),
                  pl.BlockSpec((1, C1), lambda i: (0, 0)),
                  pl.BlockSpec((Cin, Cd), lambda i: (0, 0)),
                  pl.BlockSpec((1, Cd), lambda i: (0, 0))],
        out_specs=(pl.BlockSpec((tm, C1), lambda i: (i, 0)),
                   pl.BlockSpec((tm, Cd), lambda i: (i, 0))),
        compiler_params=pltpu.CompilerParams(
            dimension_semantics=("parallel",),
            vmem_limit_bytes=_vmem_limit(est)),
    )(x2d, w1, b1, wd, bd)
    if Mp != M:
        o1, od = o1[:M], od[:M]
    return o1, od


def _pick_tr(H, W, C, budget=6 << 20):
    """Output rows per conv2 grid step: divides H, keeps the tiles in a VMEM budget."""
    for cand in range(H, 0, -1):
        if H % cand or (cand * W) % 8:
            continue
        need = 2 * (cand + 2) * (W + 2) * C * 2 + cand * W * C * (4 + 2 * 2)
        if need <= budget:
            return cand
    return H   # TODO(synk): pathological odd-W shapes; fine for ResNet-50 spatial sizes.


def conv3x3_bn_relu(o1_padded_rows, w9, shift, *, N, H, W):
    """3x3 pad-1 stride-1 conv + folded BN + ReLU.  Input: (N*(H+2), W+2, C) bf16."""
    C = w9.shape[1]
    tr = _pick_tr(H, W, C)
    est = (2 * (tr + 2) * (W + 2) * C * 2 + tr * W * C * 4
           + 2 * tr * W * C * 2 + 9 * C * C * 2 + C * 4)
    kernel = functools.partial(_conv3x3_bn_relu_kernel, tr=tr, H=H, W=W)
    return pl.pallas_call(
        kernel,
        out_shape=jax.ShapeDtypeStruct((N * H * W, C), jnp.bfloat16),
        grid=(N * (H // tr),),
        in_specs=[pl.BlockSpec(memory_space=pl.ANY),           # padded o1 (manual DMA)
                  pl.BlockSpec((9, C, C), lambda i: (0, 0, 0)),  # per-tap scaled weights
                  pl.BlockSpec((1, C), lambda i: (0, 0))],       # folded BN shift
        out_specs=pl.BlockSpec((tr * W, C), lambda i: (i, 0)),
        scratch_shapes=[pltpu.VMEM((2, tr + 2, W + 2, C), jnp.bfloat16),  # dbl buffer
                        pltpu.VMEM((tr * W, C), jnp.float32),             # f32 acc
                        pltpu.SemaphoreType.DMA((2,))],
        compiler_params=pltpu.CompilerParams(
            # 'arbitrary': the cross-step DMA prefetch requires sequential grid order.
            dimension_semantics=("arbitrary",),
            vmem_limit_bytes=_vmem_limit(est)),
    )(o1_padded_rows, w9, shift)


# ------------------------------- glue (JAX) --------------------------------

def _fold_bn(gamma, beta, mean, var, eps=1e-5):
    scale = gamma / jnp.sqrt(var + eps)
    return scale, beta - mean * scale


def _fold_conv1x1_bn(w_oihw, gamma, beta, mean, var):
    scale, shift = _fold_bn(gamma, beta, mean, var)
    w = jnp.transpose(w_oihw[:, :, 0, 0]) * scale[None, :]          # [Cin, Cout]
    return w.astype(jnp.bfloat16), shift[None, :].astype(jnp.float32)


def _fold_conv3x3_bn(w_oihw, gamma, beta, mean, var):
    cout, cin = w_oihw.shape[0], w_oihw.shape[1]
    scale, shift = _fold_bn(gamma, beta, mean, var)
    w = jnp.transpose(w_oihw, (2, 3, 1, 0)) * scale[None, None, None, :]  # [3,3,Ci,Co]
    return (w.reshape(9, cin, cout).astype(jnp.bfloat16),
            shift[None, :].astype(jnp.float32))


def bottleneck_forward_nhwc(x_nhwc, p, stride):
    """Core (NHWC).  x_nhwc: [N, H, W, Cin] -> [N, Ho, Wo, 4*Cmid] float32."""
    N, H, W, Cin = x_nhwc.shape
    Cmid = p["w1"].shape[0]
    Cexp = p["w3"].shape[0]
    x = x_nhwc.astype(jnp.bfloat16)
    x2d = x.reshape(-1, Cin)

    w1, b1 = _fold_conv1x1_bn(p["w1"], p["bn1_g"], p["bn1_b"], p["bn1_m"], p["bn1_v"])
    w2, b2 = _fold_conv3x3_bn(p["w2"], p["bn2_g"], p["bn2_b"], p["bn2_m"], p["bn2_v"])
    w3, b3 = _fold_conv1x1_bn(p["w3"], p["bn3_g"], p["bn3_b"], p["bn3_m"], p["bn3_v"])
    has_ds = (stride != 1) or (Cin != Cexp)
    if has_ds:
        wd, bd = _fold_conv1x1_bn(p["wd"], p["bnd_g"], p["bnd_b"], p["bnd_m"], p["bnd_v"])

    # ---- conv1 (+bn1+relu) and downsample branch ----
    if has_ds and stride == 1:
        o1_2d, identity = fused_conv1_downsample(x2d, w1, b1, wd, bd)
    else:
        o1_2d = fused_matmul_bn(x2d, w1, b1, relu=True)
        if has_ds:
            xd2d = x[:, ::stride, ::stride, :].reshape(-1, Cin)
            identity = fused_matmul_bn(xd2d, wd, bd, relu=False)
        else:
            identity = x2d

    # ---- conv2 (3x3, pad 1) + bn2 + relu, taps fused in-kernel (no im2col) ----
    o1p = jnp.pad(o1_2d.reshape(N, H, W, Cmid), ((0, 0), (1, 1), (1, 1), (0, 0)))
    y2 = conv3x3_bn_relu(o1p.reshape(N * (H + 2), W + 2, Cmid), w2, b2, N=N, H=H, W=W)
    if stride != 1:
        y2 = y2.reshape(N, H, W, Cmid)[:, ::stride, ::stride, :]
    Ho = (H - 1) // stride + 1
    Wo = (W - 1) // stride + 1
    o2 = y2.reshape(N * Ho * Wo, Cmid)

    # ---- conv3 (1x1) + bn3 + residual add + relu (single fused kernel) ----
    o3 = fused_matmul_bn(o2, w3, b3, relu=False, residual=identity,
                         out_dtype=jnp.float32)
    return o3.reshape(N, Ho, Wo, Cexp)


def bottleneck_forward(x_nchw, p, stride):
    """NCHW wrapper (PyTorch interface).  Hoist these transposes when chaining blocks."""
    x = jnp.transpose(x_nchw, (0, 2, 3, 1))
    out = bottleneck_forward_nhwc(x, p, stride)
    return jnp.transpose(out, (0, 3, 1, 2))


# --------------------------- pure-JAX reference -----------------------------

def _conv_ref(x, w, stride, pad):
    return jax.lax.conv_general_dilated(
        x, w, window_strides=(stride, stride),
        padding=[(pad, pad), (pad, pad)],
        dimension_numbers=("NCHW", "OIHW", "NCHW"))


def _bn_ref(x, g, b, m, v, eps=1e-5):
    rs = lambda a: a[None, :, None, None]
    return (x - rs(m)) / jnp.sqrt(rs(v) + eps) * rs(g) + rs(b)


def bottleneck_ref(x, p, stride):
    Cin = x.shape[1]
    Cexp = p["w3"].shape[0]
    if stride != 1 or Cin != Cexp:
        identity = _bn_ref(_conv_ref(x, p["wd"], stride, 0),
                           p["bnd_g"], p["bnd_b"], p["bnd_m"], p["bnd_v"])
    else:
        identity = x
    out = jax.nn.relu(_bn_ref(_conv_ref(x, p["w1"], 1, 0),
                              p["bn1_g"], p["bn1_b"], p["bn1_m"], p["bn1_v"]))
    out = jax.nn.relu(_bn_ref(_conv_ref(out, p["w2"], stride, 1),
                              p["bn2_g"], p["bn2_b"], p["bn2_m"], p["bn2_v"]))
    out = _bn_ref(_conv_ref(out, p["w3"], 1, 0),
                  p["bn3_g"], p["bn3_b"], p["bn3_m"], p["bn3_v"])
    return jax.nn.relu(out + identity)


# ---------------------------------- main ------------------------------------

def make_params(key, in_channel, out_channel, stride, expansion=4):
    cexp = out_channel * expansion
    ks = jax.random.split(key, 24)

    def bn(k, c):
        k1, k2, k3, k4 = jax.random.split(k, 4)
        return (jax.random.normal(k1, (c,), jnp.float32) * 0.5 + 1.0,   # gamma
                jax.random.normal(k2, (c,), jnp.float32) * 0.1,         # beta
                jax.random.normal(k3, (c,), jnp.float32) * 0.1,         # running_mean
                jax.random.uniform(k4, (c,), jnp.float32, 0.5, 1.5))    # running_var

    p = {}
    p["w1"] = jax.random.normal(ks[0], (out_channel, in_channel, 1, 1), jnp.float32) * 0.1
    p["w2"] = jax.random.normal(ks[1], (out_channel, out_channel, 3, 3), jnp.float32) * 0.1
    p["w3"] = jax.random.normal(ks[2], (cexp, out_channel, 1, 1), jnp.float32) * 0.1
    p["bn1_g"], p["bn1_b"], p["bn1_m"], p["bn1_v"] = bn(ks[3], out_channel)
    p["bn2_g"], p["bn2_b"], p["bn2_m"], p["bn2_v"] = bn(ks[4], out_channel)
    p["bn3_g"], p["bn3_b"], p["bn3_m"], p["bn3_v"] = bn(ks[5], cexp)
    if stride != 1 or in_channel != cexp:
        p["wd"] = jax.random.normal(ks[6], (cexp, in_channel, 1, 1), jnp.float32) * 0.1
        p["bnd_g"], p["bnd_b"], p["bnd_m"], p["bnd_v"] = bn(ks[7], cexp)
    return p


def _bf16_round(a):
    return a.astype(jnp.bfloat16).astype(jnp.float32)


def _quantize_params(p):
    q = dict(p)
    for k in ("w1", "w2", "w3", "wd"):
        if k in q:
            q[k] = _bf16_round(q[k])
    return q


if __name__ == "__main__":
    key = jax.random.PRNGKey(0)
    configs = [
        # (N, in_channel, out_channel, stride, H, W)
        (2, 16, 8, 2, 16, 16),   # strided downsample block
        (2, 16, 8, 1, 16, 16),   # stride-1 channel-expanding block (fused conv1+ds)
        (2, 32, 8, 1, 8, 8),     # identity (no downsample) block
    ]
    for idx, (N, cin, cmid, stride, H, W) in enumerate(configs):
        kx, kp = jax.random.split(jax.random.fold_in(key, idx))
        x = _bf16_round(jax.random.normal(kx, (N, cin, H, W), jnp.float32))
        params = _quantize_params(make_params(kp, cin, cmid, stride))

        out = jax.block_until_ready(bottleneck_forward(x, params, stride))
        ref = jax.block_until_ready(bottleneck_ref(x, params, stride))

        Ho = (H - 1) // stride + 1
        Wo = (W - 1) // stride + 1
        assert out.shape == (N, cmid * 4, Ho, Wo), out.shape
        assert jnp.allclose(out, ref, atol=1e-1, rtol=1e-1), (
            idx, float(jnp.max(jnp.abs(out - ref))))

    print("KERNEL_OK")
</pallas_src>

<mosaic_0001>
module attributes {stable_mosaic.version = 11 : i64} {
  func.func @_matmul_bn_kernel(%arg0: i32, %arg1: memref<512x16xbf16, #tpu.memory_space<vmem>>, %arg2: memref<16x8xbf16, #tpu.memory_space<vmem>>, %arg3: memref<1x8xf32, #tpu.memory_space<vmem>>, %arg4: memref<512x8xbf16, #tpu.memory_space<vmem>>) attributes {dimension_semantics = [#tpu.dimension_semantics<parallel>], iteration_bounds = array<i64: 1>, scalar_prefetch = 0 : i64, scratch_operands = 0 : i64, tpu.core_type = #tpu.core_type<tc>, window_params = [{transform_indices = @transform_0, window_bounds = array<i64: 512, 16>}, {pipeline_mode = #tpu.pipeline_mode<synchronous>, transform_indices = @transform_1, window_bounds = array<i64: 16, 8>}, {pipeline_mode = #tpu.pipeline_mode<synchronous>, transform_indices = @transform_2, window_bounds = array<i64: 1, 8>}, {transform_indices = @transform_3, window_bounds = array<i64: 512, 8>}]} {
    %c0 = arith.constant 0 : index
    %c0_0 = arith.constant 0 : index
    %0 = vector.load %arg1[%c0, %c0_0] : memref<512x16xbf16, #tpu.memory_space<vmem>>, vector<512x16xbf16>
    %c0_1 = arith.constant 0 : index
    %c0_2 = arith.constant 0 : index
    %1 = vector.load %arg2[%c0_1, %c0_2] : memref<16x8xbf16, #tpu.memory_space<vmem>>, vector<16x8xbf16>
    %cst = arith.constant dense<0.000000e+00> : vector<512x8xf32>
    %2 = tpu.matmul %0, %1, %cst {dimension_numbers = #tpu.dot_dimension_numbers<[1], [0], [0], [1], [0, 0, 1, 1], [], []>} : vector<512x16xbf16>, vector<16x8xbf16>, vector<512x8xf32> -> vector<512x8xf32>
    %c0_3 = arith.constant 0 : index
    %c0_4 = arith.constant 0 : index
    %3 = vector.load %arg3[%c0_3, %c0_4] : memref<1x8xf32, #tpu.memory_space<vmem>>, vector<1x8xf32>
    %4 = vector.broadcast %3 : vector<1x8xf32> to vector<512x8xf32>
    %5 = arith.addf %2, %4 : vector<512x8xf32>
    %cst_5 = arith.constant 0.000000e+00 : f32
    %6 = vector.broadcast %cst_5 : f32 to vector<512x8xf32>
    %7 = arith.maximumf %5, %6 : vector<512x8xf32>
    %8 = arith.truncf %7 : vector<512x8xf32> to vector<512x8xbf16>
    %c0_6 = arith.constant 0 : index
    %c0_7 = arith.constant 0 : index
    %9 = vector.load %arg4[%c0_6, %c0_7] : memref<512x8xbf16, #tpu.memory_space<vmem>>, vector<512x8xbf16>
    tpu.vector_store %arg4[%c0_6, %c0_7], %8 {strides = array<i32>} : memref<512x8xbf16, #tpu.memory_space<vmem>>, vector<512x8xbf16>,
    return
  }
  func.func @transform_0(%arg0: i32) -> (i32, i32) {
    %c0_i32 = arith.constant 0 : i32
    %c0_i32_0 = arith.constant 0 : i32
    return %arg0, %c0_i32 : i32, i32
  }
  func.func @transform_1(%arg0: i32) -> (i32, i32) {
    %c0_i32 = arith.constant 0 : i32
    %c0_i32_0 = arith.constant 0 : i32
    %c0_i32_1 = arith.constant 0 : i32
    return %c0_i32, %c0_i32_0 : i32, i32
  }
  func.func @transform_2(%arg0: i32) -> (i32, i32) {
    %c0_i32 = arith.constant 0 : i32
    %c0_i32_0 = arith.constant 0 : i32
    %c0_i32_1 = arith.constant 0 : i32
    return %c0_i32, %c0_i32_0 : i32, i32
  }
  func.func @transform_3(%arg0: i32) -> (i32, i32) {
    %c0_i32 = arith.constant 0 : i32
    %c0_i32_0 = arith.constant 0 : i32
    return %arg0, %c0_i32 : i32, i32
  }
}

</mosaic_0001>

<bundles_post_ra>
// kernel: tpu_custom_call.1
= control target key start
LH: loop header
LB: loop body
LE: loop exit
PB: predicated region body
PF: predicated region fallthrough
CT: control target
= control target key end

     0   :  { %vm254_vm0 = vcmask 130048   ;;  %vm960_vm1 = vcmask 60416   ;;  %s1833_s1 = inlined_call_operand.vmem [shape: bf16[16,8], index: 1, kind: input, shape index: {}]   ;;  %s1834_s0 = inlined_call_operand.vmem [shape: bf16[512,16], index: 0, kind: input, shape index: {}]   ;;  %s1835_s2 = inlined_call_operand.vmem [shape: f32[1,8], index: 2, kind: input, shape index: {}]   ;;  %s1836_s3 = inlined_call_operand.vmem [shape: bf16[512,8], index: 3, kind: output, shape index: {}]  }
   0x1   :  { %v1324_v0 = vld [vmem:[%s1833_s1] sm:$0xff]   ;;  %v1327_v3 = vld [vmem:[%s1834_s0 + $0x8] sm:$0xff]   ;;  %v1329_v5 = vld [vmem:[%s1834_s0 + $0x10] sm:$0xff]  }
   0x2   :  { %v1325_v1 = vld [vmem:[%s1834_s0] sm:$0xff]   ;;  %1256 = vmatprep.subr.bf16.mxu0 %v1324_v0  ;;  %1322 = vmatprep.subr.bf16.mxu1 %v1324_v0  ;;  %v1328_v4 = vld [vmem:[%s1834_s0 + $0x88] sm:$0xff]   ;;  %v1330_v6 = vld [vmem:[%s1834_s0 + $0x90] sm:$0xff]  }
   0x3   :  { %v1326_v2 = vld [vmem:[%s1834_s0 + $0x80] sm:$0xff]   ;;  %1257 = vmatpush3.bf16.msra.mxu0 %v1324_v0  ;;  %1323 = vmatpush3.bf16.msra.mxu1 %v1324_v0  ;;  %v1331_v7 = vld [vmem:[%s1834_s0 + $0x18] sm:$0xff]   ;;  %v1335_v11 = vld [vmem:[%s1834_s0 + $0x28] sm:$0xff]  }
   0x4   :  { %1258 = vmatprep.mubr.msk.bf16.mxu0 %vm254_vm0, %v1325_v1  ;;  %1290 = vmatprep.mubr.msk.bf16.mxu1 %vm254_vm0, %v1326_v2  ;;  %v1332_v8 = vld [vmem:[%s1834_s0 + $0x98] sm:$0xff]   ;;  %v1333_v9 = vld [vmem:[%s1834_s0 + $0x20] sm:$0xff]   ;;  %v1336_v12 = vld [vmem:[%s1834_s0 + $0xa8] sm:$0xff]  }
   0x5   :  { %v1334_v10 = vld [vmem:[%s1834_s0 + $0xa0] sm:$0xff]   ;;  %v1337_v13 = vld [vmem:[%s1834_s0 + $0x30] sm:$0xff]   ;;  %v1339_v15 = vld [vmem:[%s1834_s0 + $0x38] sm:$0xff]  }
   0x6   :  { %1259 = vmatmul.mubr.msk.bf16.vlgmr.msra.gmra.mxu0 %vm254_vm0, %v1327_v3  ;;  %1291 = vmatmul.mubr.msk.bf16.vlgmr.msra.gmra.mxu1 %vm254_vm0, %v1328_v4  ;;  %v1338_v14 = vld [vmem:[%s1834_s0 + $0xb0] sm:$0xff]   ;;  %v1340_v16 = vld [vmem:[%s1834_s0 + $0xb8] sm:$0xff]   ;;  %v1341_v17 = vld [vmem:[%s1834_s0 + $0x40] sm:$0xff]  }
   0x7   :  { %1262 = vmatprep.mubr.msk.bf16.mxu0 %vm254_vm0, %v1329_v5  ;;  %1294 = vmatprep.mubr.msk.bf16.mxu1 %vm254_vm0, %v1330_v6  ;;  %v1342_v18 = vld [vmem:[%s1834_s0 + $0xc0] sm:$0xff]   ;;  %v1343_v19 = vld [vmem:[%s1834_s0 + $0x48] sm:$0xff]   ;;  %v1345_v21 = vld [vmem:[%s1834_s0 + $0x50] sm:$0xff]  }
   0x8   :  { %v1344_v20 = vld [vmem:[%s1834_s0 + $0xc8] sm:$0xff]   ;;  %v1346_v22 = vld [vmem:[%s1834_s0 + $0xd0] sm:$0xff]   ;;  %v1347_v23 = vld [vmem:[%s1834_s0 + $0x58] sm:$0xff]  }
   0x9   :  { %v1348_v24 = vld [vmem:[%s1834_s0 + $0xd8] sm:$0xff]   ;;  %v1349_v25 = vld [vmem:[%s1834_s0 + $0x60] sm:$0xff]   ;;  %v1351_v27 = vld [vmem:[%s1834_s0 + $0x68] sm:$0xff]  }
   0xa   :  { %v1350_v26 = vld [vmem:[%s1834_s0 + $0xe0] sm:$0xff]   ;;  %v1352_v28 = vld [vmem:[%s1834_s0 + $0xe8] sm:$0xff]   ;;  %v1353_v29 = vld [vmem:[%s1834_s0 + $0x70] sm:$0xff]  }
   0xb   :  { %v1354_v30 = vld [vmem:[%s1834_s0 + $0xf0] sm:$0xff]   ;;  %v1355_v31 = vld [vmem:[%s1834_s0 + $0x78] sm:$0xff]   ;;  %v1511_v33 = vld [vmem:[%s1835_s2] ss:$0 sm:$0xff] }
   0xc   :  { %v1356_v32 = vld [vmem:[%s1834_s0 + $0xf8] sm:$0xff]  }
   0xe   :  { %1263 = vmatmul.mubr.msk.bf16.gmra.mxu0 %vm254_vm0, %v1331_v7  ;;  %1295 = vmatmul.mubr.msk.bf16.gmra.mxu1 %vm254_vm0, %v1332_v8 }
   0xf   :  { %1266 = vmatprep.mubr.msk.bf16.mxu0 %vm254_vm0, %v1333_v9  ;;  %1298 = vmatprep.mubr.msk.bf16.mxu1 %vm254_vm0, %v1334_v10 }
  0x16   :  { %1267 = vmatmul.mubr.msk.bf16.gmra.mxu0 %vm254_vm0, %v1335_v11  ;;  %1299 = vmatmul.mubr.msk.bf16.gmra.mxu1 %vm254_vm0, %v1336_v12 }
  0x17   :  { %1270 = vmatprep.mubr.msk.bf16.mxu0 %vm254_vm0, %v1337_v13  ;;  %1302 = vmatprep.mubr.msk.bf16.mxu1 %vm254_vm0, %v1338_v14 }
  0x1e   :  { %1271 = vmatmul.mubr.msk.bf16.gmra.mxu0 %vm254_vm0, %v1339_v15  ;;  %1303 = vmatmul.mubr.msk.bf16.gmra.mxu1 %vm254_vm0, %v1340_v16 }
  0x1f   :  { %1274 = vmatprep.mubr.msk.bf16.mxu0 %vm254_vm0, %v1341_v17  ;;  %1306 = vmatprep.mubr.msk.bf16.mxu1 %vm254_vm0, %v1342_v18 }
  0x26   :  { %1275 = vmatmul.mubr.msk.bf16.gmra.mxu0 %vm254_vm0, %v1343_v19  ;;  %1307 = vmatmul.mubr.msk.bf16.gmra.mxu1 %vm254_vm0, %v1344_v20 }
  0x27   :  { %1278 = vmatprep.mubr.msk.bf16.mxu0 %vm254_vm0, %v1345_v21  ;;  %1310 = vmatprep.mubr.msk.bf16.mxu1 %vm254_vm0, %v1346_v22 }
  0x2e   :  { %1279 = vmatmul.mubr.msk.bf16.gmra.mxu0 %vm254_vm0, %v1347_v23  ;;  %1311 = vmatmul.mubr.msk.bf16.gmra.mxu1 %vm254_vm0, %v1348_v24 }
  0x2f   :  { %1282 = vmatprep.mubr.msk.bf16.mxu0 %vm254_vm0, %v1349_v25  ;;  %1314 = vmatprep.mubr.msk.bf16.mxu1 %vm254_vm0, %v1350_v26 }
  0x36   :  { %1283 = vmatmul.mubr.msk.bf16.gmra.mxu0 %vm254_vm0, %v1351_v27  ;;  %1315 = vmatmul.mubr.msk.bf16.gmra.mxu1 %vm254_vm0, %v1352_v28 }
  0x37   :  { %1286 = vmatprep.mubr.msk.bf16.mxu0 %vm254_vm0, %v1353_v29  ;;  %1318 = vmatprep.mubr.msk.bf16.mxu1 %vm254_vm0, %v1354_v30 }
  0x3e   :  { %1287 = vmatmul.mubr.msk.bf16.gmra.mxu0 %vm254_vm0, %v1355_v31  ;;  %1319 = vmatmul.mubr.msk.bf16.gmra.mxu1 %vm254_vm0, %v1356_v32 }
  0xc6   :  { %v1260_v34 = vpop.f32.mrf.mxu0  ;;  %v1292_v35 = vpop.f32.mrf.mxu1 }
  0xc7   :  { %v394_v36 = vadd.f32 %v1260_v34, %v1511_v33  ;;  %v522_v37 = vadd.f32 %v1292_v35, %v1511_v33 }
  0xc8   :  { %v385_v38 = vpop.f32.mrf.mxu0  ;;  %v513_v39 = vpop.f32.mrf.mxu1 }
  0xc9   :  { %v642_v40 = vmax.f32 %v394_v36, 0.0  ;;  %v674_v41 = vmax.f32 %v522_v37, 0.0  ;;  %v386_v42 = vadd.f32 %v1511_v33, %v385_v38  ;;  %v514_v43 = vadd.f32 %v1511_v33, %v513_v39 }
  0xca   :  { %v1261_v44 = vpop.f32.mrf.mxu0  ;;  %v1293_v45 = vpop.f32.mrf.mxu1 }
  0xcb   :  { %v1161_v46 = vpack.c.bf16 %v642_v40, %v642_v40  ;;  %v1193_v47 = vpack.c.bf16 %v674_v41, %v674_v41  ;;  %v640_v48 = vmax.f32 %v386_v42, 0.0  ;;  %v672_v49 = vmax.f32 %v514_v43, 0.0 }
  0xcc   :  { %v397_v50 = vadd.f32 %v1261_v44, %v1511_v33  ;;  %v525_v51 = vadd.f32 %v1293_v45, %v1511_v33  ;;  %v388_v52 = vpop.f32.mrf.mxu0  ;;  %v516_v53 = vpop.f32.mrf.mxu1 }
  0xcd   :  { %963 = vst.msk [vmem:[%s1836_s3 + $0x8] sm:$0xf] %vm960_vm1, %v1161_v46  ;;  %995 = vst.msk [vmem:[%s1836_s3 + $0x88] sm:$0xf] %vm960_vm1, %v1193_v47  ;;  %v1159_v54 = vpack.c.bf16 %v640_v48, %v640_v48  ;;  %v1191_v55 = vpack.c.bf16 %v672_v49, %v672_v49  ;;  %v389_v56 = vadd.f32 %v1511_v33, %v388_v52 }
  0xce   :  { %v517_v57 = vadd.f32 %v1511_v33, %v516_v53  ;;  %v643_v58 = vmax.f32 %v397_v50, 0.0  ;;  %v675_v59 = vmax.f32 %v525_v51, 0.0  ;;  %v1264_v60 = vpop.f32.mrf.mxu0  ;;  %v1296_v61 = vpop.f32.mrf.mxu1 }
  0xcf   :  { %961 = vst.msk [vmem:[%s1836_s3] sm:$0xf] %vm960_vm1, %v1159_v54  ;;  %993 = vst.msk [vmem:[%s1836_s3 + $0x80] sm:$0xf] %vm960_vm1, %v1191_v55  ;;  %v641_v62 = vmax.f32 %v389_v56, 0.0  ;;  %v410_v0 = vadd.f32 %v1264_v60, %v1511_v33  ;;  %v538_v1 = vadd.f32 %v1296_v61, %v1511_v33 }
  0xd0   :  { %v673_v63 = vmax.f32 %v517_v57, 0.0  ;;  %v1162_v2 = vpack.c.bf16 %v643_v58, %v643_v58  ;;  %v1194_v3 = vpack.c.bf16 %v675_v59, %v675_v59  ;;  %v401_v4 = vpop.f32.mrf.mxu0  ;;  %v529_v5 = vpop.f32.mrf.mxu1 }
  0xd1   :  { %v1160_v6 = vpack.c.bf16 %v641_v62, %v641_v62  ;;  %v646_v8 = vmax.f32 %v410_v0, 0.0  ;;  %v678_v9 = vmax.f32 %v538_v1, 0.0  ;;  %v402_v10 = vadd.f32 %v1511_v33, %v401_v4 }
  0xd2   :  { %v1192_v7 = vpack.c.bf16 %v673_v63, %v673_v63  ;;  %964 = vst.msk [vmem:[%s1836_s3 + $0xc] sm:$0xf] %vm960_vm1, %v1162_v2  ;;  %996 = vst.msk [vmem:[%s1836_s3 + $0x8c] sm:$0xf] %vm960_vm1, %v1194_v3  ;;  %v530_v11 = vadd.f32 %v1511_v33, %v529_v5  ;;  %v1265_v12 = vpop.f32.mrf.mxu0  ;;  %v1297_v13 = vpop.f32.mrf.mxu1 }
  0xd3   :  { %962 = vst.msk [vmem:[%s1836_s3 + $0x4] sm:$0xf] %vm960_vm1, %v1160_v6  ;;  %v1165_v14 = vpack.c.bf16 %v646_v8, %v646_v8  ;;  %v1197_v15 = vpack.c.bf16 %v678_v9, %v678_v9  ;;  %v413_v16 = vadd.f32 %v1265_v12, %v1511_v33  ;;  %v541_v17 = vadd.f32 %v1297_v13, %v1511_v33 }
  0xd4   :  { %994 = vst.msk [vmem:[%s1836_s3 + $0x84] sm:$0xf] %vm960_vm1, %v1192_v7  ;;  %v644_v18 = vmax.f32 %v402_v10, 0.0  ;;  %v676_v19 = vmax.f32 %v530_v11, 0.0  ;;  %v404_v20 = vpop.f32.mrf.mxu0  ;;  %v532_v21 = vpop.f32.mrf.mxu1 }
  0xd5   :  { %967 = vst.msk [vmem:[%s1836_s3 + $0x18] sm:$0xf] %vm960_vm1, %v1165_v14  ;;  %999 = vst.msk [vmem:[%s1836_s3 + $0x98] sm:$0xf] %vm960_vm1, %v1197_v15  ;;  %v647_v22 = vmax.f32 %v413_v16, 0.0  ;;  %v679_v23 = vmax.f32 %v541_v17, 0.0  ;;  %v405_v24 = vadd.f32 %v1511_v33, %v404_v20  ;;  %v533_v25 = vadd.f32 %v1511_v33, %v532_v21 }
  0xd6   :  { %v1163_v26 = vpack.c.bf16 %v644_v18, %v644_v18  ;;  %v1195_v27 = vpack.c.bf16 %v676_v19, %v676_v19  ;;  %v1268_v28 = vpop.f32.mrf.mxu0  ;;  %v1300_v29 = vpop.f32.mrf.mxu1 }
  0xd7   :  { %v1166_v30 = vpack.c.bf16 %v647_v22, %v647_v22  ;;  %v1198_v31 = vpack.c.bf16 %v679_v23, %v679_v23  ;;  %v645_v32 = vmax.f32 %v405_v24, 0.0  ;;  %v677_v34 = vmax.f32 %v533_v25, 0.0 }
  0xd8   :  { %965 = vst.msk [vmem:[%s1836_s3 + $0x10] sm:$0xf] %vm960_vm1, %v1163_v26  ;;  %997 = vst.msk [vmem:[%s1836_s3 + $0x90] sm:$0xf] %vm960_vm1, %v1195_v27  ;;  %v426_v35 = vadd.f32 %v1268_v28, %v1511_v33  ;;  %v554_v36 = vadd.f32 %v1300_v29, %v1511_v33  ;;  %v417_v37 = vpop.f32.mrf.mxu0  ;;  %v545_v38 = vpop.f32.mrf.mxu1 }
  0xd9   :  { %968 = vst.msk [vmem:[%s1836_s3 + $0x1c] sm:$0xf] %vm960_vm1, %v1166_v30  ;;  %1000 = vst.msk [vmem:[%s1836_s3 + $0x9c] sm:$0xf] %vm960_vm1, %v1198_v31  ;;  %v1164_v39 = vpack.c.bf16 %v645_v32, %v645_v32  ;;  %v1196_v40 = vpack.c.bf16 %v677_v34, %v677_v34  ;;  %v418_v41 = vadd.f32 %v1511_v33, %v417_v37 }
  0xda   :  { %v546_v42 = vadd.f32 %v1511_v33, %v545_v38  ;;  %v650_v43 = vmax.f32 %v426_v35, 0.0  ;;  %v682_v44 = vmax.f32 %v554_v36, 0.0  ;;  %v1269_v45 = vpop.f32.mrf.mxu0  ;;  %v1301_v46 = vpop.f32.mrf.mxu1 }
  0xdb   :  { %966 = vst.msk [vmem:[%s1836_s3 + $0x14] sm:$0xf] %vm960_vm1, %v1164_v39  ;;  %998 = vst.msk [vmem:[%s1836_s3 + $0x94] sm:$0xf] %vm960_vm1, %v1196_v40  ;;  %v648_v47 = vmax.f32 %v418_v41, 0.0  ;;  %v429_v49 = vadd.f32 %v1269_v45, %v1511_v33  ;;  %v557_v50 = vadd.f32 %v1301_v46, %v1511_v33 }
  0xdc   :  { %v680_v48 = vmax.f32 %v546_v42, 0.0  ;;  %v1169_v51 = vpack.c.bf16 %v650_v43, %v650_v43  ;;  %v1201_v52 = vpack.c.bf16 %v682_v44, %v682_v44  ;;  %v420_v53 = vpop.f32.mrf.mxu0  ;;  %v548_v54 = vpop.f32.mrf.mxu1 }
  0xdd   :  { %v1167_v55 = vpack.c.bf16 %v648_v47, %v648_v47  ;;  %v651_v57 = vmax.f32 %v429_v49, 0.0  ;;  %v683_v58 = vmax.f32 %v557_v50, 0.0  ;;  %v421_v59 = vadd.f32 %v1511_v33, %v420_v53 }
  0xde   :  { %v1199_v56 = vpack.c.bf16 %v680_v48, %v680_v48  ;;  %971 = vst.msk [vmem:[%s1836_s3 + $0x28] sm:$0xf] %vm960_vm1, %v1169_v51  ;;  %1003 = vst.msk [vmem:[%s1836_s3 + $0xa8] sm:$0xf] %vm960_vm1, %v1201_v52  ;;  %v549_v60 = vadd.f32 %v1511_v33, %v548_v54  ;;  %v1272_v61 = vpop.f32.mrf.mxu0  ;;  %v1304_v62 = vpop.f32.mrf.mxu1 }
  0xdf   :  { %969 = vst.msk [vmem:[%s1836_s3 + $0x20] sm:$0xf] %vm960_vm1, %v1167_v55  ;;  %v1170_v63 = vpack.c.bf16 %v651_v57, %v651_v57  ;;  %v1202_v0 = vpack.c.bf16 %v683_v58, %v683_v58  ;;  %v442_v1 = vadd.f32 %v1272_v61, %v1511_v33  ;;  %v570_v2 = vadd.f32 %v1304_v62, %v1511_v33 }
  0xe0   :  { %1001 = vst.msk [vmem:[%s1836_s3 + $0xa0] sm:$0xf] %vm960_vm1, %v1199_v56  ;;  %v649_v3 = vmax.f32 %v421_v59, 0.0  ;;  %v681_v4 = vmax.f32 %v549_v60, 0.0  ;;  %v433_v5 = vpop.f32.mrf.mxu0  ;;  %v561_v6 = vpop.f32.mrf.mxu1 }
  0xe1   :  { %972 = vst.msk [vmem:[%s1836_s3 + $0x2c] sm:$0xf] %vm960_vm1, %v1170_v63  ;;  %1004 = vst.msk [vmem:[%s1836_s3 + $0xac] sm:$0xf] %vm960_vm1, %v1202_v0  ;;  %v654_v7 = vmax.f32 %v442_v1, 0.0  ;;  %v686_v8 = vmax.f32 %v570_v2, 0.0  ;;  %v434_v9 = vadd.f32 %v1511_v33, %v433_v5  ;;  %v562_v10 = vadd.f32 %v1511_v33, %v561_v6 }
  0xe2   :  { %v1168_v11 = vpack.c.bf16 %v649_v3, %v649_v3  ;;  %v1200_v12 = vpack.c.bf16 %v681_v4, %v681_v4  ;;  %v1273_v13 = vpop.f32.mrf.mxu0  ;;  %v1305_v14 = vpop.f32.mrf.mxu1 }
  0xe3   :  { %v1173_v15 = vpack.c.bf16 %v654_v7, %v654_v7  ;;  %v1205_v16 = vpack.c.bf16 %v686_v8, %v686_v8  ;;  %v652_v17 = vmax.f32 %v434_v9, 0.0  ;;  %v684_v18 = vmax.f32 %v562_v10, 0.0 }
  0xe4   :  { %970 = vst.msk [vmem:[%s1836_s3 + $0x24] sm:$0xf] %vm960_vm1, %v1168_v11  ;;  %1002 = vst.msk [vmem:[%s1836_s3 + $0xa4] sm:$0xf] %vm960_vm1, %v1200_v12  ;;  %v445_v19 = vadd.f32 %v1273_v13, %v1511_v33  ;;  %v573_v20 = vadd.f32 %v1305_v14, %v1511_v33  ;;  %v436_v21 = vpop.f32.mrf.mxu0  ;;  %v564_v22 = vpop.f32.mrf.mxu1 }
  0xe5   :  { %975 = vst.msk [vmem:[%s1836_s3 + $0x38] sm:$0xf] %vm960_vm1, %v1173_v15  ;;  %1007 = vst.msk [vmem:[%s1836_s3 + $0xb8] sm:$0xf] %vm960_vm1, %v1205_v16  ;;  %v1171_v23 = vpack.c.bf16 %v652_v17, %v652_v17  ;;  %v1203_v24 = vpack.c.bf16 %v684_v18, %v684_v18  ;;  %v437_v25 = vadd.f32 %v1511_v33, %v436_v21 }
  0xe6   :  { %v565_v26 = vadd.f32 %v1511_v33, %v564_v22  ;;  %v655_v27 = vmax.f32 %v445_v19, 0.0  ;;  %v687_v28 = vmax.f32 %v573_v20, 0.0  ;;  %v1276_v29 = vpop.f32.mrf.mxu0  ;;  %v1308_v30 = vpop.f32.mrf.mxu1 }
  0xe7   :  { %973 = vst.msk [vmem:[%s1836_s3 + $0x30] sm:$0xf] %vm960_vm1, %v1171_v23  ;;  %1005 = vst.msk [vmem:[%s1836_s3 + $0xb0] sm:$0xf] %vm960_vm1, %v1203_v24  ;;  %v653_v31 = vmax.f32 %v437_v25, 0.0  ;;  %v458_v34 = vadd.f32 %v1276_v29, %v1511_v33  ;;  %v586_v35 = vadd.f32 %v1308_v30, %v1511_v33 }
  0xe8   :  { %v685_v32 = vmax.f32 %v565_v26, 0.0  ;;  %v1174_v36 = vpack.c.bf16 %v655_v27, %v655_v27  ;;  %v1206_v37 = vpack.c.bf16 %v687_v28, %v687_v28  ;;  %v449_v38 = vpop.f32.mrf.mxu0  ;;  %v577_v39 = vpop.f32.mrf.mxu1 }
  0xe9   :  { %v1172_v40 = vpack.c.bf16 %v653_v31, %v653_v31  ;;  %v658_v42 = vmax.f32 %v458_v34, 0.0  ;;  %v690_v43 = vmax.f32 %v586_v35, 0.0  ;;  %v450_v44 = vadd.f32 %v1511_v33, %v449_v38 }
  0xea   :  { %v1204_v41 = vpack.c.bf16 %v685_v32, %v685_v32  ;;  %976 = vst.msk [vmem:[%s1836_s3 + $0x3c] sm:$0xf] %vm960_vm1, %v1174_v36  ;;  %1008 = vst.msk [vmem:[%s1836_s3 + $0xbc] sm:$0xf] %vm960_vm1, %v1206_v37  ;;  %v578_v45 = vadd.f32 %v1511_v33, %v577_v39  ;;  %v1277_v46 = vpop.f32.mrf.mxu0  ;;  %v1309_v47 = vpop.f32.mrf.mxu1 }
  0xeb   :  { %974 = vst.msk [vmem:[%s1836_s3 + $0x34] sm:$0xf] %vm960_vm1, %v1172_v40  ;;  %v1177_v48 = vpack.c.bf16 %v658_v42, %v658_v42  ;;  %v1209_v49 = vpack.c.bf16 %v690_v43, %v690_v43  ;;  %v461_v50 = vadd.f32 %v1277_v46, %v1511_v33  ;;  %v589_v51 = vadd.f32 %v1309_v47, %v1511_v33 }
  0xec   :  { %1006 = vst.msk [vmem:[%s1836_s3 + $0xb4] sm:$0xf] %vm960_vm1, %v1204_v41  ;;  %v656_v52 = vmax.f32 %v450_v44, 0.0  ;;  %v688_v53 = vmax.f32 %v578_v45, 0.0  ;;  %v452_v54 = vpop.f32.mrf.mxu0  ;;  %v580_v55 = vpop.f32.mrf.mxu1 }
  0xed   :  { %979 = vst.msk [vmem:[%s1836_s3 + $0x48] sm:$0xf] %vm960_vm1, %v1177_v48  ;;  %1011 = vst.msk [vmem:[%s1836_s3 + $0xc8] sm:$0xf] %vm960_vm1, %v1209_v49  ;;  %v659_v56 = vmax.f32 %v461_v50, 0.0  ;;  %v691_v57 = vmax.f32 %v589_v51, 0.0  ;;  %v453_v58 = vadd.f32 %v1511_v33, %v452_v54  ;;  %v581_v59 = vadd.f32 %v1511_v33, %v580_v55 }
  0xee   :  { %v1175_v60 = vpack.c.bf16 %v656_v52, %v656_v52  ;;  %v1207_v61 = vpack.c.bf16 %v688_v53, %v688_v53  ;;  %v1280_v62 = vpop.f32.mrf.mxu0  ;;  %v1312_v63 = vpop.f32.mrf.mxu1 }
  0xef   :  { %v1178_v0 = vpack.c.bf16 %v659_v56, %v659_v56  ;;  %v1210_v1 = vpack.c.bf16 %v691_v57, %v691_v57  ;;  %v657_v2 = vmax.f32 %v453_v58, 0.0  ;;  %v689_v3 = vmax.f32 %v581_v59, 0.0 }
  0xf0   :  { %977 = vst.msk [vmem:[%s1836_s3 + $0x40] sm:$0xf] %vm960_vm1, %v1175_v60  ;;  %1009 = vst.msk [vmem:[%s1836_s3 + $0xc0] sm:$0xf] %vm960_vm1, %v1207_v61  ;;  %v474_v4 = vadd.f32 %v1280_v62, %v1511_v33  ;;  %v602_v5 = vadd.f32 %v1312_v63, %v1511_v33  ;;  %v465_v6 = vpop.f32.mrf.mxu0  ;;  %v593_v7 = vpop.f32.mrf.mxu1 }
  0xf1   :  { %980 = vst.msk [vmem:[%s1836_s3 + $0x4c] sm:$0xf] %vm960_vm1, %v1178_v0  ;;  %1012 = vst.msk [vmem:[%s1836_s3 + $0xcc] sm:$0xf] %vm960_vm1, %v1210_v1  ;;  %v1176_v8 = vpack.c.bf16 %v657_v2, %v657_v2  ;;  %v1208_v9 = vpack.c.bf16 %v689_v3, %v689_v3  ;;  %v466_v10 = vadd.f32 %v1511_v33, %v465_v6 }
  0xf2   :  { %v594_v11 = vadd.f32 %v1511_v33, %v593_v7  ;;  %v662_v12 = vmax.f32 %v474_v4, 0.0  ;;  %v694_v13 = vmax.f32 %v602_v5, 0.0  ;;  %v1281_v14 = vpop.f32.mrf.mxu0  ;;  %v1313_v15 = vpop.f32.mrf.mxu1 }
  0xf3   :  { %978 = vst.msk [vmem:[%s1836_s3 + $0x44] sm:$0xf] %vm960_vm1, %v1176_v8  ;;  %1010 = vst.msk [vmem:[%s1836_s3 + $0xc4] sm:$0xf] %vm960_vm1, %v1208_v9  ;;  %v660_v16 = vmax.f32 %v466_v10, 0.0  ;;  %v477_v18 = vadd.f32 %v1281_v14, %v1511_v33  ;;  %v605_v19 = vadd.f32 %v1313_v15, %v1511_v33 }
  0xf4   :  { %v692_v17 = vmax.f32 %v594_v11, 0.0  ;;  %v1181_v20 = vpack.c.bf16 %v662_v12, %v662_v12  ;;  %v1213_v21 = vpack.c.bf16 %v694_v13, %v694_v13  ;;  %v468_v22 = vpop.f32.mrf.mxu0  ;;  %v596_v23 = vpop.f32.mrf.mxu1 }
  0xf5   :  { %v1179_v24 = vpack.c.bf16 %v660_v16, %v660_v16  ;;  %v663_v26 = vmax.f32 %v477_v18, 0.0  ;;  %v695_v27 = vmax.f32 %v605_v19, 0.0  ;;  %v469_v28 = vadd.f32 %v1511_v33, %v468_v22 }
  0xf6   :  { %v1211_v25 = vpack.c.bf16 %v692_v17, %v692_v17  ;;  %983 = vst.msk [vmem:[%s1836_s3 + $0x58] sm:$0xf] %vm960_vm1, %v1181_v20  ;;  %1015 = vst.msk [vmem:[%s1836_s3 + $0xd8] sm:$0xf] %vm960_vm1, %v1213_v21  ;;  %v597_v29 = vadd.f32 %v1511_v33, %v596_v23  ;;  %v1284_v30 = vpop.f32.mrf.mxu0  ;;  %v1316_v31 = vpop.f32.mrf.mxu1 }
  0xf7   :  { %981 = vst.msk [vmem:[%s1836_s3 + $0x50] sm:$0xf] %vm960_vm1, %v1179_v24  ;;  %v1182_v32 = vpack.c.bf16 %v663_v26, %v663_v26  ;;  %v1214_v34 = vpack.c.bf16 %v695_v27, %v695_v27  ;;  %v490_v35 = vadd.f32 %v1284_v30, %v1511_v33  ;;  %v618_v36 = vadd.f32 %v1316_v31, %v1511_v33 }
  0xf8   :  { %1013 = vst.msk [vmem:[%s1836_s3 + $0xd0] sm:$0xf] %vm960_vm1, %v1211_v25  ;;  %v661_v37 = vmax.f32 %v469_v28, 0.0  ;;  %v693_v38 = vmax.f32 %v597_v29, 0.0  ;;  %v481_v39 = vpop.f32.mrf.mxu0  ;;  %v609_v40 = vpop.f32.mrf.mxu1 }
  0xf9   :  { %984 = vst.msk [vmem:[%s1836_s3 + $0x5c] sm:$0xf] %vm960_vm1, %v1182_v32  ;;  %1016 = vst.msk [vmem:[%s1836_s3 + $0xdc] sm:$0xf] %vm960_vm1, %v1214_v34  ;;  %v666_v41 = vmax.f32 %v490_v35, 0.0  ;;  %v698_v42 = vmax.f32 %v618_v36, 0.0  ;;  %v482_v43 = vadd.f32 %v1511_v33, %v481_v39  ;;  %v610_v44 = vadd.f32 %v1511_v33, %v609_v40 }
  0xfa   :  { %v1180_v45 = vpack.c.bf16 %v661_v37, %v661_v37  ;;  %v1212_v46 = vpack.c.bf16 %v693_v38, %v693_v38  ;;  %v1285_v47 = vpop.f32.mrf.mxu0  ;;  %v1317_v48 = vpop.f32.mrf.mxu1 }
  0xfb   :  { %v1185_v49 = vpack.c.bf16 %v666_v41, %v666_v41  ;;  %v1217_v50 = vpack.c.bf16 %v698_v42, %v698_v42  ;;  %v664_v51 = vmax.f32 %v482_v43, 0.0  ;;  %v696_v52 = vmax.f32 %v610_v44, 0.0 }
  0xfc   :  { %982 = vst.msk [vmem:[%s1836_s3 + $0x54] sm:$0xf] %vm960_vm1, %v1180_v45  ;;  %1014 = vst.msk [vmem:[%s1836_s3 + $0xd4] sm:$0xf] %vm960_vm1, %v1212_v46  ;;  %v493_v53 = vadd.f32 %v1285_v47, %v1511_v33  ;;  %v621_v54 = vadd.f32 %v1317_v48, %v1511_v33  ;;  %v484_v55 = vpop.f32.mrf.mxu0  ;;  %v612_v56 = vpop.f32.mrf.mxu1 }
  0xfd   :  { %987 = vst.msk [vmem:[%s1836_s3 + $0x68] sm:$0xf] %vm960_vm1, %v1185_v49  ;;  %1019 = vst.msk [vmem:[%s1836_s3 + $0xe8] sm:$0xf] %vm960_vm1, %v1217_v50  ;;  %v1183_v57 = vpack.c.bf16 %v664_v51, %v664_v51  ;;  %v1215_v58 = vpack.c.bf16 %v696_v52, %v696_v52  ;;  %v485_v59 = vadd.f32 %v1511_v33, %v484_v55 }
  0xfe   :  { %v613_v60 = vadd.f32 %v1511_v33, %v612_v56  ;;  %v667_v61 = vmax.f32 %v493_v53, 0.0  ;;  %v699_v62 = vmax.f32 %v621_v54, 0.0  ;;  %v1288_v63 = vpop.f32.mrf.mxu0  ;;  %v1320_v0 = vpop.f32.mrf.mxu1 }
  0xff   :  { %985 = vst.msk [vmem:[%s1836_s3 + $0x60] sm:$0xf] %vm960_vm1, %v1183_v57  ;;  %1017 = vst.msk [vmem:[%s1836_s3 + $0xe0] sm:$0xf] %vm960_vm1, %v1215_v58  ;;  %v665_v1 = vmax.f32 %v485_v59, 0.0  ;;  %v506_v3 = vadd.f32 %v1288_v63, %v1511_v33  ;;  %v634_v4 = vadd.f32 %v1320_v0, %v1511_v33 }
 0x100   :  { %v697_v2 = vmax.f32 %v613_v60, 0.0  ;;  %v1186_v5 = vpack.c.bf16 %v667_v61, %v667_v61  ;;  %v1218_v6 = vpack.c.bf16 %v699_v62, %v699_v62  ;;  %v497_v7 = vpop.f32.mrf.mxu0  ;;  %v625_v8 = vpop.f32.mrf.mxu1 }
 0x101   :  { %v1184_v9 = vpack.c.bf16 %v665_v1, %v665_v1  ;;  %v670_v11 = vmax.f32 %v506_v3, 0.0  ;;  %v702_v12 = vmax.f32 %v634_v4, 0.0  ;;  %v498_v13 = vadd.f32 %v1511_v33, %v497_v7 }
 0x102   :  { %v1216_v10 = vpack.c.bf16 %v697_v2, %v697_v2  ;;  %988 = vst.msk [vmem:[%s1836_s3 + $0x6c] sm:$0xf] %vm960_vm1, %v1186_v5  ;;  %1020 = vst.msk [vmem:[%s1836_s3 + $0xec] sm:$0xf] %vm960_vm1, %v1218_v6  ;;  %v626_v14 = vadd.f32 %v1511_v33, %v625_v8  ;;  %v1289_v15 = vpop.f32.mrf.mxu0  ;;  %v1321_v16 = vpop.f32.mrf.mxu1 }
 0x103   :  { %986 = vst.msk [vmem:[%s1836_s3 + $0x64] sm:$0xf] %vm960_vm1, %v1184_v9  ;;  %v1189_v17 = vpack.c.bf16 %v670_v11, %v670_v11  ;;  %v1221_v18 = vpack.c.bf16 %v702_v12, %v702_v12  ;;  %v509_v19 = vadd.f32 %v1289_v15, %v1511_v33  ;;  %v637_v20 = vadd.f32 %v1321_v16, %v1511_v33 }
 0x104   :  { %1018 = vst.msk [vmem:[%s1836_s3 + $0xe4] sm:$0xf] %vm960_vm1, %v1216_v10  ;;  %v668_v21 = vmax.f32 %v498_v13, 0.0  ;;  %v700_v22 = vmax.f32 %v626_v14, 0.0  ;;  %v500_v23 = vpop.f32.mrf.mxu0  ;;  %v628_v24 = vpop.f32.mrf.mxu1 }
 0x105   :  { %991 = vst.msk [vmem:[%s1836_s3 + $0x78] sm:$0xf] %vm960_vm1, %v1189_v17  ;;  %1023 = vst.msk [vmem:[%s1836_s3 + $0xf8] sm:$0xf] %vm960_vm1, %v1221_v18  ;;  %v671_v25 = vmax.f32 %v509_v19, 0.0  ;;  %v703_v26 = vmax.f32 %v637_v20, 0.0  ;;  %v501_v27 = vadd.f32 %v1511_v33, %v500_v23  ;;  %v629_v28 = vadd.f32 %v1511_v33, %v628_v24 }
 0x106   :  { %v1187_v29 = vpack.c.bf16 %v668_v21, %v668_v21  ;;  %v1219_v30 = vpack.c.bf16 %v700_v22, %v700_v22 }
 0x107   :  { %v1190_v31 = vpack.c.bf16 %v671_v25, %v671_v25  ;;  %v1222_v32 = vpack.c.bf16 %v703_v26, %v703_v26  ;;  %v669_v34 = vmax.f32 %v501_v27, 0.0  ;;  %v701_v35 = vmax.f32 %v629_v28, 0.0 }
 0x108   :  { %989 = vst.msk [vmem:[%s1836_s3 + $0x70] sm:$0xf] %vm960_vm1, %v1187_v29  ;;  %1021 = vst.msk [vmem:[%s1836_s3 + $0xf0] sm:$0xf] %vm960_vm1, %v1219_v30 }
 0x109   :  { %992 = vst.msk [vmem:[%s1836_s3 + $0x7c] sm:$0xf] %vm960_vm1, %v1190_v31  ;;  %1024 = vst.msk [vmem:[%s1836_s3 + $0xfc] sm:$0xf] %vm960_vm1, %v1222_v32  ;;  %v1188_v33 = vpack.c.bf16 %v669_v34, %v669_v34  ;;  %v1220_v36 = vpack.c.bf16 %v701_v35, %v701_v35 }
 0x10b   :  { %990 = vst.msk [vmem:[%s1836_s3 + $0x74] sm:$0xf] %vm960_vm1, %v1188_v33  ;;  %1022 = vst.msk [vmem:[%s1836_s3 + $0xf4] sm:$0xf] %vm960_vm1, %v1220_v36 }

</bundles_post_ra>
